<compile_context>
chip_gen: v6e
topology: v6e:2x2x1
jax: 0.10.0
libtpu: 0.0.40
codegen_flags: <defaults>
</compile_context>

<pallas_src>
import functools

import jax
import jax.numpy as jnp
from jax.experimental import pallas as pl
from jax.experimental.pallas import tpu as pltpu

MARGIN = 0.5      # module __init__ default
EPS = 1e-6        # nn.PairwiseDistance default eps


def _contrastive_loss_kernel(x1_ref, x2_ref, y_ref, out_ref, *, tb, batch):
    pid = pl.program_id(0)

    # Zero the resident (1,1) accumulator on the first grid step.
    @pl.when(pid == 0)
    def _():
        out_ref[...] = jnp.zeros_like(out_ref)

    # Upcast after the (possibly bf16) load — accumulate squared sums in f32.
    x1 = x1_ref[...].astype(jnp.float32)                         # (tb, D)
    x2 = x2_ref[...].astype(jnp.float32)                         # (tb, D)
    y = y_ref[...].astype(jnp.float32)                           # (tb, 1)

    diff = x1 - x2 + EPS                                         # (tb, D)
    sq_sum = jnp.sum(diff * diff, axis=-1, keepdims=True)        # (tb, 1)
    dist = jnp.sqrt(sq_sum)                                      # (tb, 1)

    margin = jnp.where(y == -1.0, MARGIN, 0.0)                   # (tb, 1)
    contrib = jnp.maximum(dist - margin, 0.0) * y                # (tb, 1)

    # Mask padded rows of the ragged last tile so they contribute exactly 0.
    rows = pid * tb + jax.lax.broadcasted_iota(jnp.int32, (tb, 1), 0)
    contrib = jnp.where(rows < batch, contrib, 0.0)

    out_ref[...] += jnp.sum(contrib, axis=0, keepdims=True)      # (1, 1)

    # Finalize: divide the accumulated sum by the true batch size.
    @pl.when(pid == pl.num_programs(0) - 1)
    def _():
        out_ref[...] = out_ref[...] * jnp.float32(1.0 / batch)


def _choose_tile_rows(batch, feat, itemsize, budget_bytes=16 * 1024 * 1024):
    # Budget: 2 inputs x 2 pipeline buffers x (tb x D) x itemsize <= budget.
    tb = budget_bytes // max(1, 4 * feat * itemsize)
    tb = max(8, min(tb, 2048))
    tb = (tb // 8) * 8                      # sublane multiple of 8
    b_padded = ((batch + 7) // 8) * 8
    return min(tb, b_padded)


def contrastive_loss(x1, x2, y):
    """x1, x2: (B, D) float (f32 or bf16); y: (B,) of +1/-1. Returns scalar f32."""
    B, D = x1.shape
    y2d = y.reshape(B, 1).astype(jnp.float32)

    itemsize = jnp.dtype(x1.dtype).itemsize
    tb = _choose_tile_rows(B, D, itemsize)
    grid = (pl.cdiv(B, tb),)

    kernel = functools.partial(_contrastive_loss_kernel, tb=tb, batch=B)

    cost = pl.CostEstimate(
        flops=4 * B * D,                     # sub, +eps, square, reduce-add
        transcendentals=B,                   # sqrt per row
        bytes_accessed=2 * B * D * itemsize + B * 4 + 4,
    )

    out = pl.pallas_call(
        kernel,
        out_shape=jax.ShapeDtypeStruct((1, 1), jnp.float32),
        grid=grid,
        in_specs=[
            pl.BlockSpec((tb, D), lambda b: (b, 0)),
            pl.BlockSpec((tb, D), lambda b: (b, 0)),
            pl.BlockSpec((tb, 1), lambda b: (b, 0)),
        ],
        out_specs=pl.BlockSpec((1, 1), lambda b: (0, 0)),
        compiler_params=pltpu.CompilerParams(
            dimension_semantics=("arbitrary",),      # batch axis is a reduction
            vmem_limit_bytes=64 * 1024 * 1024,
        ),
        cost_estimate=cost,
    )(x1, x2, y2d)
    return out[0, 0]


def _reference(x1, x2, y):
    # Pure-JAX reference mirroring the PyTorch forward (f32 math).
    x1 = x1.astype(jnp.float32)
    x2 = x2.astype(jnp.float32)
    y = y.astype(jnp.float32)
    diff = x1 - x2 + EPS
    dist = jnp.sqrt(jnp.sum(diff * diff, axis=-1))
    margin = jnp.where(y == -1.0, MARGIN, 0.0)
    dist = jnp.maximum(dist - margin, 0.0)
    return jnp.mean(dist * y)


if __name__ == "__main__":
    key = jax.random.PRNGKey(0)
    k1, k2, k3 = jax.random.split(key, 3)

    # Case 1: f32, batch multiple of 8.
    B, D = 8, 32
    x1 = jax.random.normal(k1, (B, D), dtype=jnp.float32)
    x2 = jax.random.normal(k2, (B, D), dtype=jnp.float32)
    y = jnp.where(jax.random.bernoulli(k3, 0.5, (B,)), 1.0, -1.0).astype(jnp.float32)

    loss = jax.block_until_ready(contrastive_loss(x1, x2, y))
    ref = _reference(x1, x2, y)
    assert jnp.allclose(loss, ref, atol=1e-5, rtol=1e-5), (loss, ref)

    # Case 2: bf16 streaming (upcast happens inside the kernel).
    loss_bf = jax.block_until_ready(
        contrastive_loss(x1.astype(jnp.bfloat16), x2.astype(jnp.bfloat16), y)
    )
    ref_bf = _reference(x1.astype(jnp.bfloat16), x2.astype(jnp.bfloat16), y)
    assert jnp.allclose(loss_bf, ref_bf, atol=1e-4, rtol=1e-4), (loss_bf, ref_bf)

    # Case 3: ragged batch (exercises the iota mask on the last tile).
    Br = 13
    k4, k5, k6 = jax.random.split(jax.random.PRNGKey(1), 3)
    x1r = jax.random.normal(k4, (Br, D), dtype=jnp.float32)
    x2r = jax.random.normal(k5, (Br, D), dtype=jnp.float32)
    yr = jnp.where(jax.random.bernoulli(k6, 0.5, (Br,)), 1.0, -1.0).astype(jnp.float32)

    loss_r = jax.block_until_ready(contrastive_loss(x1r, x2r, yr))
    ref_r = _reference(x1r, x2r, yr)
    assert jnp.allclose(loss_r, ref_r, atol=1e-5, rtol=1e-5), (loss_r, ref_r)

    print("KERNEL_OK")
</pallas_src>

<mosaic_0001>
module attributes {stable_mosaic.version = 11 : i64} {
  func.func @_contrastive_loss_kernel(%arg0: i32, %arg1: memref<8x32xf32, #tpu.memory_space<vmem>>, %arg2: memref<8x32xf32, #tpu.memory_space<vmem>>, %arg3: memref<8x1xf32, #tpu.memory_space<vmem>>, %arg4: memref<1x1xf32, #tpu.memory_space<vmem>>) attributes {dimension_semantics = [#tpu.dimension_semantics<arbitrary>], iteration_bounds = array<i64: 1>, scalar_prefetch = 0 : i64, scratch_operands = 0 : i64, tpu.core_type = #tpu.core_type<tc>, window_params = [{transform_indices = @transform_0, window_bounds = array<i64: 8, 32>}, {transform_indices = @transform_1, window_bounds = array<i64: 8, 32>}, {transform_indices = @transform_2, window_bounds = array<i64: 8, 1>}, {pipeline_mode = #tpu.pipeline_mode<synchronous>, transform_indices = @transform_3, window_bounds = array<i64: 1, 1>}]} {
    %c0_i32 = arith.constant 0 : i32
    %0 = arith.cmpi eq, %arg0, %c0_i32 : i32
    %1 = arith.extui %0 : i1 to i32
    %c0_i32_0 = arith.constant 0 : i32
    %2 = arith.cmpi ne, %1, %c0_i32_0 : i32
    scf.if %2 {
      %cst_20 = arith.constant 0.000000e+00 : f32
      %38 = vector.broadcast %cst_20 : f32 to vector<1x1xf32>
      %c0_21 = arith.constant 0 : index
      %c0_22 = arith.constant 0 : index
      %39 = vector.load %arg4[%c0_21, %c0_22] : memref<1x1xf32, #tpu.memory_space<vmem>>, vector<1x1xf32>
      tpu.vector_store %arg4[%c0_21, %c0_22], %38 {strides = array<i32>} : memref<1x1xf32, #tpu.memory_space<vmem>>, vector<1x1xf32>,
    } else {
    }
    %c0 = arith.constant 0 : index
    %c0_1 = arith.constant 0 : index
    %3 = vector.load %arg1[%c0, %c0_1] : memref<8x32xf32, #tpu.memory_space<vmem>>, vector<8x32xf32>
    %c0_2 = arith.constant 0 : index
    %c0_3 = arith.constant 0 : index
    %4 = vector.load %arg2[%c0_2, %c0_3] : memref<8x32xf32, #tpu.memory_space<vmem>>, vector<8x32xf32>
    %c0_4 = arith.constant 0 : index
    %c0_5 = arith.constant 0 : index
    %5 = vector.load %arg3[%c0_4, %c0_5] : memref<8x1xf32, #tpu.memory_space<vmem>>, vector<8x1xf32>
    %6 = arith.subf %3, %4 : vector<8x32xf32>
    %cst = arith.constant 9.99999997E-7 : f32
    %7 = vector.broadcast %cst : f32 to vector<8x32xf32>
    %8 = arith.addf %6, %7 : vector<8x32xf32>
    %9 = arith.mulf %8, %8 : vector<8x32xf32>
    %cst_6 = arith.constant dense<0.000000e+00> : vector<8xf32>
    %10 = vector.multi_reduction <add>, %9, %cst_6 [1] : vector<8x32xf32> to vector<8xf32>
    %11 = vector.shape_cast %10 : vector<8xf32> to vector<8x1xf32>
    %12 = math.sqrt %11 : vector<8x1xf32>
    %cst_7 = arith.constant -1.000000e+00 : f32
    %13 = vector.broadcast %cst_7 : f32 to vector<8x1xf32>
    %14 = arith.cmpf oeq, %5, %13 : vector<8x1xf32>
    %cst_8 = arith.constant 5.000000e-01 : f32
    %cst_9 = arith.constant 0.000000e+00 : f32
    %15 = vector.broadcast %cst_8 : f32 to vector<8x1xf32>
    %16 = vector.broadcast %cst_9 : f32 to vector<8x1xf32>
    %17 = arith.select %14, %15, %16 : vector<8x1xi1>, vector<8x1xf32>
    %18 = arith.subf %12, %17 : vector<8x1xf32>
    %cst_10 = arith.constant 0.000000e+00 : f32
    %19 = vector.broadcast %cst_10 : f32 to vector<8x1xf32>
    %20 = arith.maximumf %18, %19 : vector<8x1xf32>
    %21 = arith.mulf %20, %5 : vector<8x1xf32>
    %c8_i32 = arith.constant 8 : i32
    %22 = arith.muli %arg0, %c8_i32 : i32
    %23 = tpu.iota {dimensions = array<i32: 0>} : vector<8x1xi32>
    %24 = vector.broadcast %22 : i32 to vector<8x1xi32>
    %25 = arith.addi %24, %23 : vector<8x1xi32>
    %c8_i32_11 = arith.constant 8 : i32
    %26 = vector.broadcast %c8_i32_11 : i32 to vector<8x1xi32>
    %27 = arith.cmpi slt, %25, %26 : vector<8x1xi32>
    %cst_12 = arith.constant 0.000000e+00 : f32
    %28 = vector.broadcast %cst_12 : f32 to vector<8x1xf32>
    %29 = arith.select %27, %21, %28 : vector<8x1xi1>, vector<8x1xf32>
    %c0_13 = arith.constant 0 : index
    %c0_14 = arith.constant 0 : index
    %30 = vector.load %arg4[%c0_13, %c0_14] : memref<1x1xf32, #tpu.memory_space<vmem>>, vector<1x1xf32>
    %cst_15 = arith.constant dense<0.000000e+00> : vector<1xf32>
    %31 = vector.multi_reduction <add>, %29, %cst_15 [0] : vector<8x1xf32> to vector<1xf32>
    %32 = vector.shape_cast %31 : vector<1xf32> to vector<1x1xf32>
    %33 = arith.addf %30, %32 : vector<1x1xf32>
    %c0_16 = arith.constant 0 : index
    %c0_17 = arith.constant 0 : index
    %34 = vector.load %arg4[%c0_16, %c0_17] : memref<1x1xf32, #tpu.memory_space<vmem>>, vector<1x1xf32>
    tpu.vector_store %arg4[%c0_16, %c0_17], %33 {strides = array<i32>} : memref<1x1xf32, #tpu.memory_space<vmem>>, vector<1x1xf32>,
    %c0_i32_18 = arith.constant 0 : i32
    %35 = arith.cmpi eq, %arg0, %c0_i32_18 : i32
    %36 = arith.extui %35 : i1 to i32
    %c0_i32_19 = arith.constant 0 : i32
    %37 = arith.cmpi ne, %36, %c0_i32_19 : i32
    scf.if %37 {
      %c0_20 = arith.constant 0 : index
      %c0_21 = arith.constant 0 : index
      %38 = vector.load %arg4[%c0_20, %c0_21] : memref<1x1xf32, #tpu.memory_space<vmem>>, vector<1x1xf32>
      %cst_22 = arith.constant 1.250000e-01 : f32
      %39 = vector.broadcast %cst_22 : f32 to vector<1x1xf32>
      %40 = arith.mulf %38, %39 : vector<1x1xf32>
      %c0_23 = arith.constant 0 : index
      %c0_24 = arith.constant 0 : index
      %41 = vector.load %arg4[%c0_23, %c0_24] : memref<1x1xf32, #tpu.memory_space<vmem>>, vector<1x1xf32>
      tpu.vector_store %arg4[%c0_23, %c0_24], %40 {strides = array<i32>} : memref<1x1xf32, #tpu.memory_space<vmem>>, vector<1x1xf32>,
    } else {
    }
    return
  }
  func.func @transform_0(%arg0: i32) -> (i32, i32) {
    %c0_i32 = arith.constant 0 : i32
    %c0_i32_0 = arith.constant 0 : i32
    return %arg0, %c0_i32 : i32, i32
  }
  func.func @transform_1(%arg0: i32) -> (i32, i32) {
    %c0_i32 = arith.constant 0 : i32
    %c0_i32_0 = arith.constant 0 : i32
    return %arg0, %c0_i32 : i32, i32
  }
  func.func @transform_2(%arg0: i32) -> (i32, i32) {
    %c0_i32 = arith.constant 0 : i32
    %c0_i32_0 = arith.constant 0 : i32
    return %arg0, %c0_i32 : i32, i32
  }
  func.func @transform_3(%arg0: i32) -> (i32, i32) {
    %c0_i32 = arith.constant 0 : i32
    %c0_i32_0 = arith.constant 0 : i32
    %c0_i32_1 = arith.constant 0 : i32
    return %c0_i32, %c0_i32_0 : i32, i32
  }
}

</mosaic_0001>

<bundles_post_ra>
// kernel: tpu_custom_call.1
= control target key start
LH: loop header
LB: loop body
LE: loop exit
PB: predicated region body
PF: predicated region fallthrough
CT: control target
= control target key end

     0   :  { %8 = vsyncpa [#allocation3], 0  ;;  %s182_s0 = inlined_call_operand.vmem [shape: f32[8,32], index: 0, kind: input, shape index: {}]   ;;  %s183_s1 = inlined_call_operand.hbm [shape: f32[8,32], index: 1, kind: input, shape index: {}]   ;;  %s184_s2 = inlined_call_operand.vmem [shape: f32[8,1], index: 2, kind: input, shape index: {}]   ;;  %s185_s3 = inlined_call_operand.hbm [shape: f32[1,1], index: 3, kind: output, shape index: {}]  }
   0x1   :  { %9 = vsyncpa [#allocation4], 0  ;;  %s144_s12 = smov [#allocation2]  }
   0x2   :  { %s18_s13 = sshll.u32 %s144_s12, 4  ;;  %s19_s13 = int_to_ptr.vmem [resolvable:$true] %s18_s13 }
   0x3   :  { %s108_s14 = scalar_lea.vmem %s19_s13, 128  ;;  %p113_p1 = scmp.lt.s32.totalorder %s19_s13, %s19_s13 }
   0x4   :  { %p109_p0 = scmp.ne.s32.totalorder %s19_s13, %s108_s14  ;;  %p114_p2 = scmp.lt.s32.totalorder %s108_s14, %s108_s14 }
   0x6   :  { %p115_p3 = por %p114_p2, %p113_p1 }
   0x8   :  { %p116_p4 = pnand %p115_p3, %p109_p0 }
   0xa   :  { %119 = shalt.err (!%p116_p4)
}
   0xb   :  { %21 = dma.hbm_to_vmem [thread:$0]  %s183_s1, 128, %s19_s13, [#allocation3]  }
   0xc   :  { %140 = dma.done.wait [#allocation3], 128  }
   0xd   :  { %141 = vsyncadd [#allocation3], 4294967168  ;;  %v33_v0 = vld [vmem:[%s182_s0] sm:$0xff]  ;;  %vm39_vm0 = vcmask 261120   ;;  %vm31_vm1 = vcmask 0   ;;  %v145_v6 = vmov 0.0  }
   0xe   :  { %v34_v1 = vld [vmem:[#allocation2] sm:$0xff]  ;;  %32 = vst.msk [vmem:[#allocation5] sm:$0x1] %vm31_vm1, %v145_v6  ;;  %vm63_vm5 = vcmask 7168   ;;  %s146_s0 = smov [#allocation5]  }
   0xf   :  { %v36_v2 = vsub.f32 %v33_v0, %v34_v1  ;;  %v35_v8 = vld [vmem:[%s184_s2] sm:$0xff]  ;;  %s86_s2 = sshll.u32 %s146_s0, 4  ;;  %s87_s2 = int_to_ptr.vmem [resolvable:$true] %s86_s2 }
  0x10   :  { %vm50_vm2 = vcmp.eq.f32.partialorder %v35_v8, -1.0  ;;  %s120_s20 = scalar_lea.vmem %s87_s2, 16  ;;  %s124_s21 = scalar_lea.vmem %s87_s2, 32 }
  0x11   :  { %v37_v3 = vadd.f32 1e-06, %v36_v2  ;;  %v51_v12 = vsel %vm50_vm2, 0.5, %v145_v6  ;;  %p121_p5 = scmp.ne.s32.totalorder %s87_s2, %s120_s20  ;;  %p125_p6 = scmp.lt.s32.totalorder %s87_s2, %s87_s2 }
  0x12   :  { %p126_p7 = scmp.lt.s32.totalorder %s124_s21, %s120_s20 }
  0x13   :  { %v38_v4 = vmul.f32 %v37_v3, %v37_v3 }
  0x14   :  { %p127_p8 = por %p126_p7, %p125_p6 }
  0x15   :  { %v40_v5 = vsel %vm39_vm0, %v38_v4, 0.0  ;;  %v62_v24 = vld [vmem:[#allocation5] sm:$0x1] }
  0x16   :  { %41 = vadd.xlane.f32.xlu0 %v40_v5  ;;  %p128_p9 = pnand %p127_p8, %p121_p5 }
  0x9f   :  { %v42_v7 = vpop.xlane.xlu0 %41 }
  0xa0   :  { %98 = vrsqrt.f32 %v42_v7  ;;  %vm45_vm3 = vcmp.eq.f32.partialorder %v42_v7, inf  ;;  %v48_v11 = vand.u32 2147483648, %v42_v7  ;;  %vm47_vm4 = vcmp.eq.f32.partialorder %v42_v7, 0.0 }
  0xad   :  { %v99_v9 = vpop.eup %98 }
  0xae   :  { %v44_v10 = vmul.f32 %v99_v9, %v42_v7 }
  0xb0   :  { %v46_v13 = vsel %vm45_vm3, %v42_v7, %v44_v10 }
  0xb1   :  { %v49_v14 = vsel %vm47_vm4, %v48_v11, %v46_v13 }
  0xb2   :  { %v52_v15 = vsub.f32 %v49_v14, %v51_v12 }
  0xb4   :  { %v53_v16 = vmax.f32 %v52_v15, 0.0 }
  0xb6   :  { %v54_v17 = vmul.f32 %v53_v16, %v35_v8 }
  0xb8   :  { %v64_v18 = vsel %vm63_vm5, %v54_v17, 0.0 }
  0xb9   :  { %v65_v19 = vrot.slane %v64_v18, 4 }
  0xbb   :  { %v66_v20 = vadd.f32 %v65_v19, %v64_v18 }
  0xbd   :  { %v67_v21 = vrot.slane %v66_v20, 2 }
  0xbf   :  { %v68_v22 = vadd.f32 %v67_v21, %v66_v20 }
  0xc1   :  { %v69_v23 = vrot.slane %v68_v22, 1 }
  0xc3   :  { %v70_v25 = vadd.f32 %v69_v23, %v68_v22 }
  0xc5   :  { %v71_v26 = vadd.f32 %v70_v25, %v62_v24 }
  0xc7   :  { %73 = vst.msk [vmem:[#allocation5] sm:$0x1] %vm31_vm1, %v71_v26 }
  0xce   :  { %v77_v27 = vld [vmem:[#allocation5] sm:$0x1] }
  0xcf   :  { %v78_v28 = vmul.f32 0.125, %v77_v27 }
  0xd1   :  { %79 = vst.msk [vmem:[#allocation5] sm:$0x1] %vm31_vm1, %v78_v28 }
  0xd2   :  { %131 = shalt.err (!%p128_p9)
}
  0xd3   :  { %89 = dma.vmem_to_hbm [thread:$0]  %s87_s2, 16, %s185_s3, [#allocation4]  }
  0xd4   :  { %142 = dma.done.wait [#allocation4], 16  }
  0xd5   :  { %143 = vsyncadd [#allocation4], 4294967280 }
  0xd6   :  { %93 = vsyncpa [#allocation3], 1 }
  0xd7   :  { %94 = vsyncpa [#allocation4], 1 }

</bundles_post_ra>
